<compile_context>
chip_gen: v6e
topology: v6e:2x2x1
jax: 0.10.0
libtpu: 0.0.40
codegen_flags: <defaults>
</compile_context>

<pallas_src>
import math

import jax
import jax.numpy as jnp
from jax.experimental import pallas as pl
from jax.experimental.pallas import tpu as pltpu

_GELU_C = math.sqrt(2.0 / math.pi)


def _ffn_kernel(x_ref, w1_ref, b1_ref, w2_ref, b2_ref, o_ref, acc_ref):
    # x_ref: (tm, H), w1_ref: (H, tf), b1_ref: (1, tf), w2_ref: (tf, H), b2_ref: (1, H)
    # o_ref: (tm, H), acc_ref: (tm, H) f32 scratch persisting across the F-block axis.
    k = pl.program_id(1)

    # linear1 partial: native-dtype operands, f32 MXU accumulation.
    h = jnp.dot(x_ref[...], w1_ref[...], preferred_element_type=jnp.float32)
    h = h + b1_ref[...].astype(jnp.float32)

    # tanh-approx GELU (exactly the reference formula), factored to minimize VPU muls;
    # the tanh goes to the EUP slot.
    inner = (_GELU_C * h) * (1.0 + 0.044715 * (h * h))
    h = 0.5 * h * (1.0 + jnp.tanh(inner))

    # dropout is identity at inference.
    # TODO(synk): training-mode dropout (stochastic masking) not implemented.

    # linear2 partial: cast activation back to operand dtype for the MXU, accumulate in f32.
    partial = jnp.dot(h.astype(w2_ref.dtype), w2_ref[...],
                      preferred_element_type=jnp.float32)

    @pl.when(k == 0)
    def _():
        acc_ref[...] = jnp.zeros_like(acc_ref)

    acc_ref[...] += partial

    @pl.when(k == pl.num_programs(1) - 1)
    def _():
        o_ref[...] = (acc_ref[...] + b2_ref[...].astype(jnp.float32)).astype(o_ref.dtype)


def _round_up(x, m):
    return -(-x // m) * m


def _pick_tm(M, dtype):
    # Sublane packing: 16 rows for 16-bit dtypes, 8 for 32-bit.
    sub = 16 if jnp.dtype(dtype).itemsize == 2 else 8
    if M >= 512:
        return 512  # >=256 rows keeps the 2x256^2 MXU (v6e/v7x) fed; tunable per chip.
    return max(sub, _round_up(M, sub))


def _pick_tf(F):
    if F <= 512:
        return F
    for cand in (512, 384, 256, 128):
        if F % cand == 0:
            return cand
    return F  # no lane-aligned divisor: keep F un-split (full block).


def positionwise_feed_forward(x, w1, b1, w2, b2, *, tm=None, tf=None):
    """x: (B, S, H); w1: (H, F); b1: (F,); w2: (F, H); b2: (H,). Returns (B, S, H)."""
    B, S, H = x.shape
    Hin, F = w1.shape
    assert Hin == H and w2.shape == (F, H) and b1.shape == (F,) and b2.shape == (H,)

    M = B * S
    x2d = x.reshape(M, H)

    if tm is None:
        tm = _pick_tm(M, x.dtype)
    if tf is None:
        tf = _pick_tf(F)
    assert F % tf == 0

    # Pad rows so any batch*seq runs with the large pipelined tile; tail sliced off below.
    M_pad = _round_up(M, tm)
    if M_pad != M:
        x2d = jnp.pad(x2d, ((0, M_pad - M), (0, 0)))

    b1_2d = b1.reshape(1, F)
    b2_2d = b2.reshape(1, H)

    itemsize = jnp.dtype(x.dtype).itemsize
    bytes_accessed = (
        M_pad * H * itemsize                                  # x
        + w1.size * jnp.dtype(w1.dtype).itemsize
        + b1.size * jnp.dtype(b1.dtype).itemsize
        + w2.size * jnp.dtype(w2.dtype).itemsize
        + b2.size * jnp.dtype(b2.dtype).itemsize
        + M_pad * H * itemsize)                               # out
    cost = pl.CostEstimate(flops=4 * M_pad * H * F,
                           transcendentals=M_pad * F,
                           bytes_accessed=bytes_accessed)

    out2d = pl.pallas_call(
        _ffn_kernel,
        out_shape=jax.ShapeDtypeStruct((M_pad, H), x.dtype),
        grid_spec=pltpu.PrefetchScalarGridSpec(
            num_scalar_prefetch=0,
            grid=(M_pad // tm, F // tf),
            in_specs=[
                pl.BlockSpec((tm, H), lambda i, k: (i, 0)),   # x row tile (reused over k)
                pl.BlockSpec((H, tf), lambda i, k: (0, k)),   # W1 F-block (streamed)
                pl.BlockSpec((1, tf), lambda i, k: (0, k)),   # b1 F-block
                pl.BlockSpec((tf, H), lambda i, k: (k, 0)),   # W2 F-block (streamed)
                pl.BlockSpec((1, H), lambda i, k: (0, 0)),    # b2 (constant, tiny)
            ],
            out_specs=pl.BlockSpec((tm, H), lambda i, k: (i, 0)),
            scratch_shapes=[pltpu.VMEM((tm, H), jnp.float32)],
        ),
        compiler_params=pltpu.CompilerParams(
            dimension_semantics=("parallel", "arbitrary"),
            vmem_limit_bytes=48 * 1024 * 1024,
        ),
        cost_estimate=cost,
    )(x2d, w1, b1_2d, w2, b2_2d)

    if M_pad != M:
        out2d = out2d[:M]
    return out2d.reshape(B, S, H)


def _reference(x, w1, b1, w2, b2):
    h = jnp.einsum("bsh,hf->bsf", x, w1) + b1
    h = 0.5 * h * (1.0 + jnp.tanh(_GELU_C * (h + 0.044715 * h ** 3)))
    return jnp.einsum("bsf,fh->bsh", h, w2) + b2


if __name__ == "__main__":
    # small shapes consistent with the module: (batch=2, seq=8, hidden=32), ff_dim=64
    B, S, H, FF = 2, 8, 32, 64

    key = jax.random.PRNGKey(0)
    kx, k1, k2, k3, k4 = jax.random.split(key, 5)

    x = jax.random.normal(kx, (B, S, H), dtype=jnp.float32)

    # deterministic parameter init (uniform, like nn.Linear's default scaling)
    lim1 = 1.0 / math.sqrt(H)
    lim2 = 1.0 / math.sqrt(FF)
    w1 = jax.random.uniform(k1, (H, FF), minval=-lim1, maxval=lim1, dtype=jnp.float32)
    b1 = jax.random.uniform(k2, (FF,), minval=-lim1, maxval=lim1, dtype=jnp.float32)
    w2 = jax.random.uniform(k3, (FF, H), minval=-lim2, maxval=lim2, dtype=jnp.float32)
    b2 = jax.random.uniform(k4, (H,), minval=-lim2, maxval=lim2, dtype=jnp.float32)

    out = positionwise_feed_forward(x, w1, b1, w2, b2)
    out = jax.block_until_ready(out)

    ref = _reference(x, w1, b1, w2, b2)
    assert out.shape == (B, S, H)
    assert jnp.allclose(out, ref, atol=1e-5, rtol=1e-5)

    print("KERNEL_OK")
</pallas_src>

<mosaic_0001>
module attributes {stable_mosaic.version = 11 : i64} {
  func.func @_ffn_kernel(%arg0: i32, %arg1: i32, %arg2: memref<16x32xf32, #tpu.memory_space<vmem>>, %arg3: memref<32x64xf32, #tpu.memory_space<vmem>>, %arg4: memref<1x64xf32, #tpu.memory_space<vmem>>, %arg5: memref<64x32xf32, #tpu.memory_space<vmem>>, %arg6: memref<1x32xf32, #tpu.memory_space<vmem>>, %arg7: memref<16x32xf32, #tpu.memory_space<vmem>>, %arg8: memref<16x32xf32, #tpu.memory_space<vmem>>) attributes {dimension_semantics = [#tpu.dimension_semantics<parallel>, #tpu.dimension_semantics<arbitrary>], iteration_bounds = array<i64: 1, 1>, scalar_prefetch = 0 : i64, scratch_operands = 1 : i64, tpu.core_type = #tpu.core_type<tc>, window_params = [{transform_indices = @transform_0, window_bounds = array<i64: 16, 32>}, {transform_indices = @transform_1, window_bounds = array<i64: 32, 64>}, {transform_indices = @transform_2, window_bounds = array<i64: 1, 64>}, {transform_indices = @transform_3, window_bounds = array<i64: 64, 32>}, {pipeline_mode = #tpu.pipeline_mode<synchronous>, transform_indices = @transform_4, window_bounds = array<i64: 1, 32>}, {transform_indices = @transform_5, window_bounds = array<i64: 16, 32>}]} {
    %c0 = arith.constant 0 : index
    %c0_0 = arith.constant 0 : index
    %0 = vector.load %arg2[%c0, %c0_0] : memref<16x32xf32, #tpu.memory_space<vmem>>, vector<16x32xf32>
    %c0_1 = arith.constant 0 : index
    %c0_2 = arith.constant 0 : index
    %1 = vector.load %arg3[%c0_1, %c0_2] : memref<32x64xf32, #tpu.memory_space<vmem>>, vector<32x64xf32>
    %cst = arith.constant dense<0.000000e+00> : vector<16x64xf32>
    %2 = tpu.matmul %0, %1, %cst {dimension_numbers = #tpu.dot_dimension_numbers<[1], [0], [0], [1], [0, 0, 1, 1], [], []>} : vector<16x32xf32>, vector<32x64xf32>, vector<16x64xf32> -> vector<16x64xf32>
    %c0_3 = arith.constant 0 : index
    %c0_4 = arith.constant 0 : index
    %3 = vector.load %arg4[%c0_3, %c0_4] : memref<1x64xf32, #tpu.memory_space<vmem>>, vector<1x64xf32>
    %4 = vector.broadcast %3 : vector<1x64xf32> to vector<16x64xf32>
    %5 = arith.addf %2, %4 : vector<16x64xf32>
    %cst_5 = arith.constant 0.797884583 : f32
    %6 = vector.broadcast %cst_5 : f32 to vector<16x64xf32>
    %7 = arith.mulf %6, %5 : vector<16x64xf32>
    %8 = arith.mulf %5, %5 : vector<16x64xf32>
    %cst_6 = arith.constant 4.471500e-02 : f32
    %9 = vector.broadcast %cst_6 : f32 to vector<16x64xf32>
    %10 = arith.mulf %9, %8 : vector<16x64xf32>
    %cst_7 = arith.constant 1.000000e+00 : f32
    %11 = vector.broadcast %cst_7 : f32 to vector<16x64xf32>
    %12 = arith.addf %11, %10 : vector<16x64xf32>
    %13 = arith.mulf %7, %12 : vector<16x64xf32>
    %cst_8 = arith.constant 5.000000e-01 : f32
    %14 = vector.broadcast %cst_8 : f32 to vector<16x64xf32>
    %15 = arith.mulf %14, %5 : vector<16x64xf32>
    %16 = math.tanh %13 : vector<16x64xf32>
    %cst_9 = arith.constant 1.000000e+00 : f32
    %17 = vector.broadcast %cst_9 : f32 to vector<16x64xf32>
    %18 = arith.addf %17, %16 : vector<16x64xf32>
    %19 = arith.mulf %15, %18 : vector<16x64xf32>
    %c0_10 = arith.constant 0 : index
    %c0_11 = arith.constant 0 : index
    %20 = vector.load %arg5[%c0_10, %c0_11] : memref<64x32xf32, #tpu.memory_space<vmem>>, vector<64x32xf32>
    %cst_12 = arith.constant dense<0.000000e+00> : vector<16x32xf32>
    %21 = tpu.matmul %19, %20, %cst_12 {dimension_numbers = #tpu.dot_dimension_numbers<[1], [0], [0], [1], [0, 0, 1, 1], [], []>} : vector<16x64xf32>, vector<64x32xf32>, vector<16x32xf32> -> vector<16x32xf32>
    %c0_i32 = arith.constant 0 : i32
    %22 = arith.cmpi eq, %arg1, %c0_i32 : i32
    %23 = arith.extui %22 : i1 to i32
    %c0_i32_13 = arith.constant 0 : i32
    %24 = arith.cmpi ne, %23, %c0_i32_13 : i32
    scf.if %24 {
      %cst_20 = arith.constant 0.000000e+00 : f32
      %31 = vector.broadcast %cst_20 : f32 to vector<16x32xf32>
      %c0_21 = arith.constant 0 : index
      %c0_22 = arith.constant 0 : index
      %32 = vector.load %arg8[%c0_21, %c0_22] : memref<16x32xf32, #tpu.memory_space<vmem>>, vector<16x32xf32>
      tpu.vector_store %arg8[%c0_21, %c0_22], %31 {strides = array<i32>} : memref<16x32xf32, #tpu.memory_space<vmem>>, vector<16x32xf32>,
    } else {
    }
    %c0_14 = arith.constant 0 : index
    %c0_15 = arith.constant 0 : index
    %25 = vector.load %arg8[%c0_14, %c0_15] : memref<16x32xf32, #tpu.memory_space<vmem>>, vector<16x32xf32>
    %26 = arith.addf %25, %21 : vector<16x32xf32>
    %c0_16 = arith.constant 0 : index
    %c0_17 = arith.constant 0 : index
    %27 = vector.load %arg8[%c0_16, %c0_17] : memref<16x32xf32, #tpu.memory_space<vmem>>, vector<16x32xf32>
    tpu.vector_store %arg8[%c0_16, %c0_17], %26 {strides = array<i32>} : memref<16x32xf32, #tpu.memory_space<vmem>>, vector<16x32xf32>,
    %c0_i32_18 = arith.constant 0 : i32
    %28 = arith.cmpi eq, %arg1, %c0_i32_18 : i32
    %29 = arith.extui %28 : i1 to i32
    %c0_i32_19 = arith.constant 0 : i32
    %30 = arith.cmpi ne, %29, %c0_i32_19 : i32
    scf.if %30 {
      %c0_20 = arith.constant 0 : index
      %c0_21 = arith.constant 0 : index
      %31 = vector.load %arg8[%c0_20, %c0_21] : memref<16x32xf32, #tpu.memory_space<vmem>>, vector<16x32xf32>
      %c0_22 = arith.constant 0 : index
      %c0_23 = arith.constant 0 : index
      %32 = vector.load %arg6[%c0_22, %c0_23] : memref<1x32xf32, #tpu.memory_space<vmem>>, vector<1x32xf32>
      %33 = vector.broadcast %32 : vector<1x32xf32> to vector<16x32xf32>
      %34 = arith.addf %31, %33 : vector<16x32xf32>
      %c0_24 = arith.constant 0 : index
      %c0_25 = arith.constant 0 : index
      %35 = vector.load %arg7[%c0_24, %c0_25] : memref<16x32xf32, #tpu.memory_space<vmem>>, vector<16x32xf32>
      tpu.vector_store %arg7[%c0_24, %c0_25], %34 {strides = array<i32>} : memref<16x32xf32, #tpu.memory_space<vmem>>, vector<16x32xf32>,
    } else {
    }
    return
  }
  func.func @transform_0(%arg0: i32, %arg1: i32) -> (i32, i32) {
    %c0_i32 = arith.constant 0 : i32
    %c0_i32_0 = arith.constant 0 : i32
    return %arg0, %c0_i32 : i32, i32
  }
  func.func @transform_1(%arg0: i32, %arg1: i32) -> (i32, i32) {
    %c0_i32 = arith.constant 0 : i32
    %c0_i32_0 = arith.constant 0 : i32
    return %c0_i32, %arg1 : i32, i32
  }
  func.func @transform_2(%arg0: i32, %arg1: i32) -> (i32, i32) {
    %c0_i32 = arith.constant 0 : i32
    %c0_i32_0 = arith.constant 0 : i32
    return %c0_i32, %arg1 : i32, i32
  }
  func.func @transform_3(%arg0: i32, %arg1: i32) -> (i32, i32) {
    %c0_i32 = arith.constant 0 : i32
    %c0_i32_0 = arith.constant 0 : i32
    return %arg1, %c0_i32 : i32, i32
  }
  func.func @transform_4(%arg0: i32, %arg1: i32) -> (i32, i32) {
    %c0_i32 = arith.constant 0 : i32
    %c0_i32_0 = arith.constant 0 : i32
    %c0_i32_1 = arith.constant 0 : i32
    return %c0_i32, %c0_i32_0 : i32, i32
  }
  func.func @transform_5(%arg0: i32, %arg1: i32) -> (i32, i32) {
    %c0_i32 = arith.constant 0 : i32
    %c0_i32_0 = arith.constant 0 : i32
    return %arg0, %c0_i32 : i32, i32
  }
}

</mosaic_0001>

<bundles_post_ra>
// kernel: tpu_custom_call.1
= control target key start
LH: loop header
LB: loop body
LE: loop exit
PB: predicated region body
PF: predicated region fallthrough
CT: control target
= control target key end

     0   :  { %vm34_vm0 = vcmask 261120   ;;  %s443_s0 = inlined_call_operand.vmem [shape: f32[16,32], index: 0, kind: input, shape index: {}]   ;;  %s444_s1 = inlined_call_operand.vmem [shape: f32[32,64], index: 1, kind: input, shape index: {}]   ;;  %s445_s2 = inlined_call_operand.vmem [shape: f32[1,64], index: 2, kind: input, shape index: {}]   ;;  %s446_s3 = inlined_call_operand.vmem [shape: f32[64,32], index: 3, kind: input, shape index: {}]   ;;  %s447_s4 = inlined_call_operand.vmem [shape: f32[1,32], index: 4, kind: input, shape index: {}]   ;;  %s448_s5 = inlined_call_operand.hbm [shape: f32[16,32], index: 5, kind: output, shape index: {}]  }
   0x1   :  { %v26_v0 = vld [vmem:[%s444_s1 + $0x18] sm:$0xff]  ;;  %v25_v1 = vld [vmem:[%s444_s1 + $0x10] sm:$0xff]  ;;  %v21_v2 = vld [vmem:[%s443_s0] sm:$0xff] }
   0x2   :  { %290 = vmatprep.subr.mxu0 %v26_v0  ;;  %v24_v3 = vld [vmem:[%s444_s1 + $0x8] sm:$0xff]  ;;  %298 = vmatprep.mubr.msk.f32.mxu0 %vm34_vm0, %v21_v2 }
   0x3   :  { %291 = vmatpush3.msra.mxu0 %v26_v0 }
   0x4   :  { %10 = vsyncpa [#allocation4], 0  ;;  %292 = vmatprep.subr.mxu0 %v25_v1  ;;  %v23_v4 = vld [vmem:[%s444_s1] sm:$0xff]  ;;  %v22_v5 = vld [vmem:[%s443_s0 + $0x8] sm:$0xff]  ;;  %vm142_vm1 = vcmask 523264   ;;  %v350_v37 = vmov 0.0  }
   0x5   :  { %293 = vmatpush3.msra.mxu0 %v25_v1  ;;  %v141_v6 = vld [vmem:[%s446_s3 + $0x38] sm:$0xff]  ;;  %v140_v7 = vld [vmem:[%s446_s3 + $0x30] sm:$0xff]  ;;  %v139_v8 = vld [vmem:[%s446_s3 + $0x28] sm:$0xff]  ;;  %229 = vst.msk [vmem:[#allocation2 + $0x8] sm:$0xff] %vm34_vm0, %v350_v37  ;;  %s351_s21 = smov [#allocation3]  }
   0x6   :  { %294 = vmatprep.subr.mxu0 %v24_v3  ;;  %301 = vmatprep.subr.mxu1 %v141_v6  ;;  %v138_v9 = vld [vmem:[%s446_s3 + $0x20] sm:$0xff]  ;;  %v137_v10 = vld [vmem:[%s446_s3 + $0x18] sm:$0xff]  ;;  %v136_v11 = vld [vmem:[%s446_s3 + $0x10] sm:$0xff]  ;;  %228 = vst.msk [vmem:[#allocation2] sm:$0xff] %vm34_vm0, %v350_v37  ;;  %s257_s22 = sshll.u32 %s351_s21, 4  ;;  %s258_s22 = int_to_ptr.vmem [resolvable:$true] %s257_s22 }
   0x7   :  { %295 = vmatpush3.msra.mxu0 %v24_v3  ;;  %302 = vmatpush3.msra.mxu1 %v141_v6  ;;  %v135_v12 = vld [vmem:[%s446_s3 + $0x8] sm:$0xff]  ;;  %v134_v13 = vld [vmem:[%s446_s3] sm:$0xff]  ;;  %s328_s23 = scalar_lea.vmem %s258_s22, 256  ;;  %p333_p1 = scmp.lt.s32.totalorder %s258_s22, %s258_s22 }
   0x8   :  { %296 = vmatprep.subr.mxu0 %v23_v4  ;;  %303 = vmatprep.subr.mxu1 %v140_v7  ;;  %v268_v14 = vld [vmem:[%s445_s2] ss:$0 sm:$0xff]  ;;  %p329_p0 = scmp.ne.s32.totalorder %s258_s22, %s328_s23  ;;  %p334_p2 = scmp.lt.s32.totalorder %s328_s23, %s328_s23 }
   0x9   :  { %297 = vmatpush3.msra.mxu0 %v23_v4  ;;  %304 = vmatpush3.msra.mxu1 %v140_v7  ;;  %v273_v44 = vld [vmem:[%s447_s4] ss:$0 sm:$0xff] }
   0xa   :  { %299 = vmatmul.mubr.msk.f32.vlgmr.msra.gmra.mxu0 %vm34_vm0, %v22_v5  ;;  %305 = vmatprep.subr.mxu1 %v139_v8  ;;  %p335_p3 = por %p334_p2, %p333_p1 }
   0xb   :  { %306 = vmatpush3.msra.mxu1 %v139_v8 }
   0xc   :  { %307 = vmatprep.subr.mxu1 %v138_v9  ;;  %v231_v38 = vld [vmem:[#allocation2 + $0x8] sm:$0xff]  ;;  %p336_p4 = pnand %p335_p3, %p329_p0 }
   0xd   :  { %308 = vmatpush3.msra.mxu1 %v138_v9  ;;  %v230_v40 = vld [vmem:[#allocation2] sm:$0xff] }
   0xe   :  { %309 = vmatprep.subr.mxu1 %v137_v10 }
   0xf   :  { %310 = vmatpush3.msra.mxu1 %v137_v10 }
  0x10   :  { %311 = vmatprep.subr.mxu1 %v136_v11 }
  0x11   :  { %312 = vmatpush3.msra.mxu1 %v136_v11 }
  0x12   :  { %313 = vmatprep.subr.mxu1 %v135_v12 }
  0x13   :  { %314 = vmatpush3.msra.mxu1 %v135_v12 }
  0x14   :  { %315 = vmatprep.subr.mxu1 %v134_v13 }
  0x15   :  { %316 = vmatpush3.msra.mxu1 %v134_v13 }
  0xca   :  { %v300_v15 = vpop.f32.mrf.mxu0 }
  0xcb   :  { %v113_v16 = vadd.f32 %v300_v15, %v268_v14 }
  0xcc   :  { %v107_v17 = vpop.f32.mrf.mxu0 }
  0xcd   :  { %v119_v18 = vmul.f32 %v113_v16, %v113_v16  ;;  %v108_v19 = vadd.f32 %v268_v14, %v107_v17  ;;  %v117_v22 = vmul.f32 0.7978846, %v113_v16  ;;  %v127_v34 = vmul.f32 0.5, %v113_v16 }
  0xcf   :  { %v121_v20 = vmul.f32 0.044715, %v119_v18  ;;  %v118_v21 = vmul.f32 %v108_v19, %v108_v19  ;;  %v116_v26 = vmul.f32 0.7978846, %v108_v19  ;;  %v126_v32 = vmul.f32 0.5, %v108_v19 }
  0xd1   :  { %v123_v23 = vadd.f32 1.0, %v121_v20  ;;  %v120_v24 = vmul.f32 0.044715, %v118_v21 }
  0xd3   :  { %v125_v25 = vmul.f32 %v123_v23, %v117_v22  ;;  %v122_v27 = vadd.f32 1.0, %v120_v24 }
  0xd5   :  { %324 = vtanh.f32 %v125_v25  ;;  %v124_v28 = vmul.f32 %v122_v27, %v116_v26 }
  0xd7   :  { %326 = vtanh.f32 %v124_v28 }
  0xe2   :  { %v325_v29 = vpop.eup %324 }
  0xe3   :  { %v131_v31 = vadd.f32 1.0, %v325_v29 }
  0xe4   :  { %v327_v30 = vpop.eup %326 }
  0xe5   :  { %v130_v33 = vadd.f32 1.0, %v327_v30  ;;  %v133_v36 = vmul.f32 %v131_v31, %v127_v34 }
  0xe7   :  { %v132_v35 = vmul.f32 %v130_v33, %v126_v32 }
  0xe9   :  { %317 = vmatprep.mubr.msk.f32.mxu1 %vm142_vm1, %v132_v35 }
  0xea   :  { %318 = vmatmul.mubr.msk.f32.vlgmr.msra.gmra.mxu1 %vm142_vm1, %v133_v36 }
 0x1aa   :  { %v319_v39 = vpop.f32.mrf.mxu1 }
 0x1ab   :  { %v233_v41 = vadd.f32 %v319_v39, %v231_v38 }
 0x1ac   :  { %v215_v42 = vpop.f32.mrf.mxu1 }
 0x1ad   :  { %235 = vst.msk [vmem:[#allocation2 + $0x8] sm:$0xff] %vm34_vm0, %v233_v41  ;;  %v232_v43 = vadd.f32 %v230_v40, %v215_v42 }
 0x1af   :  { %234 = vst.msk [vmem:[#allocation2] sm:$0xff] %vm34_vm0, %v232_v43 }
 0x1b4   :  { %v240_v45 = vld [vmem:[#allocation2 + $0x8] sm:$0xff] }
 0x1b5   :  { %v249_v46 = vadd.f32 %v273_v44, %v240_v45 }
 0x1b6   :  { %v239_v47 = vld [vmem:[#allocation2] sm:$0xff] }
 0x1b7   :  { %v248_v48 = vadd.f32 %v273_v44, %v239_v47  ;;  %251 = vst.msk [vmem:[#allocation3 + $0x8] sm:$0xff] %vm34_vm0, %v249_v46 }
 0x1b9   :  { %250 = vst.msk [vmem:[#allocation3] sm:$0xff] %vm34_vm0, %v248_v48 }
 0x1ba   :  { %339 = shalt.err (!%p336_p4)
}
 0x1bb   :  { %s352_s24 = smov 128   ;;  %s353_s4 = smov 8  }
 0x1bc   :  { %263 = dma.vmem_to_hbm [thread:$0]  %s258_s22, 256, %s448_s5, [#allocation4], %s352_s24, %s352_s24, %s353_s4  }
 0x1bd   :  { %348 = dma.done.wait [#allocation4], 256  }
 0x1be   :  { %349 = vsyncadd [#allocation4], 4294967040 }
 0x1bf   :  { %267 = vsyncpa [#allocation4], 1 }

</bundles_post_ra>
